<compile_context>
chip_gen: v5e
topology: v5e:2x2
jax: 0.10.0
libtpu: 0.0.40
codegen_flags: <defaults>
</compile_context>

<pallas_src>
import jax
import jax.numpy as jnp
from jax.experimental import pallas as pl
from jax.experimental.pallas import tpu as pltpu

HIDDEN_LOGICAL = 400   # hidden1 in the PyTorch module
HIDDEN_PADDED = 512    # lane-aligned padded hidden width (zero-padded, exact)


def _round_up(x, m):
    return ((x + m - 1) // m) * m


def _choose_tiles(B, batch_tile):
    """Minimal-padding batch tiling.

    nb is chosen first (cdiv), then TB = round_up(cdiv(B, nb), 8), so padding
    waste is < 8 rows per tile.  For B >= 512 we force nb >= 2 so the
    "parallel" batch axis gives both v7x TensorCores work (near-free on
    v5e/v6e: one extra ~0.35 us grid step).
    """
    nb = max(1, pl.cdiv(B, batch_tile))
    if B >= 512:
        nb = max(nb, 2)
    TB = _round_up(pl.cdiv(B, nb), 8)
    return nb, TB, nb * TB


def critic_kernel(ego_ref, w1_ref, w2_ref, b2_ref, w3_ref, b3_ref, q_ref):
    # fc1 + ReLU: concat([x, a]) and the b1 add are folded into this single
    # bf16 MXU matmul (ego carries an extra ones column, w1 carries b1 row).
    h1 = jnp.dot(ego_ref[...], w1_ref[...], preferred_element_type=jnp.float32)
    h1 = jnp.maximum(h1, 0.0)
    # fc2 + ReLU: bf16 operands, f32 accumulation on the MXU.
    h2 = jnp.dot(h1.astype(jnp.bfloat16), w2_ref[...],
                 preferred_element_type=jnp.float32)
    h2 = jnp.maximum(h2 + b2_ref[...], 0.0)
    # fc3: N=1 output -> VPU multiply + XLU cross-lane reduce (kept off the
    # MXU; fc2 already saturates it on v5e).  Column [TB, 1] store kept: the
    # lane-dense [1, TB] emission would need a sublane->lane relayout with
    # shaky Mosaic support, and Q writeback traffic is tiny.
    q = jnp.sum(h2 * w3_ref[...], axis=-1, keepdims=True) + b3_ref[...]
    q_ref[...] = q.astype(q_ref.dtype)


def critic_forward(x, a, packed_params, *, batch_tile=1024):
    """x: [B, state_dim] f32, a: [B, 1] f32 -> Q: [B, 1] f32."""
    w1p, w2p, b2p, w3r, b3p = packed_params
    B, D = x.shape
    Kp = w1p.shape[0]          # state_dim + 2 (action column + bias column)
    H = w2p.shape[0]
    assert Kp == D + 2, "packed fc1 weight does not match state_dim"

    nb, TB, B_pad = _choose_tiles(B, batch_tile)

    # Fused "ego" input: [x | a | 1] so fc1 (incl. bias) is one bf16 matmul.
    ego = jnp.concatenate([x, a, jnp.ones((B, 1), x.dtype)], axis=1)
    if B_pad != B:
        ego = jnp.pad(ego, ((0, B_pad - B), (0, 0)))
    ego = ego.astype(jnp.bfloat16)

    flops = 2 * B_pad * (Kp * H + H * H + H)
    bytes_accessed = (ego.size * 2 + (w1p.size + w2p.size) * 2
                      + (b2p.size + w3r.size + b3p.size) * 4
                      + B_pad * 4)

    grid_spec = pltpu.PrefetchScalarGridSpec(
        num_scalar_prefetch=0,
        grid=(nb,),
        in_specs=[
            # Batch tile: streamed + double-buffered by BlockSpec.
            pl.BlockSpec((TB, Kp), lambda i: (i, 0)),
            # Weights/biases: constant block index -> fetched once, stay
            # VMEM-resident (~0.6 MB total, far under every gen's VMEM).
            pl.BlockSpec(w1p.shape, lambda i: (0, 0)),
            pl.BlockSpec(w2p.shape, lambda i: (0, 0)),
            pl.BlockSpec(b2p.shape, lambda i: (0, 0)),
            pl.BlockSpec(w3r.shape, lambda i: (0, 0)),
            pl.BlockSpec(b3p.shape, lambda i: (0, 0)),
        ],
        out_specs=pl.BlockSpec((TB, 1), lambda i: (i, 0)),
    )

    q = pl.pallas_call(
        critic_kernel,
        out_shape=jax.ShapeDtypeStruct((B_pad, 1), jnp.float32),
        grid_spec=grid_spec,
        compiler_params=pltpu.CompilerParams(
            dimension_semantics=("parallel",),        # megacore sharding (v7x)
            vmem_limit_bytes=32 * 1024 * 1024),       # headroom for TB ~ 2048
        cost_estimate=pl.CostEstimate(
            flops=int(flops), transcendentals=0,
            bytes_accessed=int(bytes_accessed)),
    )(ego, w1p, w2p, b2p, w3r, b3p)
    return q[:B]


def init_params(key, state_dim):
    """nn.Linear-style init (uniform +/- 1/sqrt(fan_in)), logical shapes.
    Weights stored as [in, out] (transposed vs PyTorch's [out, in])."""
    d_in = state_dim + 1
    keys = jax.random.split(key, 6)

    def lin(kw, kb, fan_in, fan_out):
        bound = 1.0 / float(fan_in) ** 0.5
        w = jax.random.uniform(kw, (fan_in, fan_out), jnp.float32, -bound, bound)
        b = jax.random.uniform(kb, (fan_out,), jnp.float32, -bound, bound)
        return w, b

    w1, b1 = lin(keys[0], keys[1], d_in, HIDDEN_LOGICAL)
    w2, b2 = lin(keys[2], keys[3], HIDDEN_LOGICAL, HIDDEN_LOGICAL)
    w3, b3 = lin(keys[4], keys[5], HIDDEN_LOGICAL, 1)
    return (w1, b1, w2, b2, w3, b3)


def pack_params(params, hidden_padded=HIDDEN_PADDED):
    """Pad hidden dim 400 -> 512 (zeros, exact), fold b1 into the fc1 weight
    (paired with the ones column appended to ego) and cast MXU weights to
    bf16."""
    w1, b1, w2, b2, w3, b3 = params            # w1: [state_dim+1, 400]
    h = w1.shape[1]
    p = hidden_padded - h
    w1f = jnp.concatenate([w1, b1.reshape(1, -1)], axis=0)      # [D+2, 400]
    w1p = jnp.pad(w1f, ((0, 0), (0, p))).astype(jnp.bfloat16)   # [D+2, 512]
    w2p = jnp.pad(w2, ((0, p), (0, p))).astype(jnp.bfloat16)
    b2p = jnp.pad(b2, (0, p)).reshape(1, hidden_padded).astype(jnp.float32)
    w3r = jnp.pad(w3[:, 0], (0, p)).reshape(1, hidden_padded).astype(jnp.float32)
    b3p = b3.reshape(1, 1).astype(jnp.float32)
    return (w1p, w2p, b2p, w3r, b3p)


if __name__ == "__main__":
    key = jax.random.PRNGKey(0)
    k_params, k_small, k_big = jax.random.split(key, 3)

    state_dim = 22  # matches the n_stops-style small state
    raw_params = init_params(k_params, state_dim)
    params = pack_params(raw_params)
    w1, b1, w2, b2, w3, b3 = raw_params

    hi = jax.lax.Precision.HIGHEST

    def run_and_check(batch, data_key):
        kx, ka = jax.random.split(data_key)
        x = jax.random.normal(kx, (batch, state_dim), jnp.float32)
        a = jax.random.normal(ka, (batch, 1), jnp.float32)

        q = jax.block_until_ready(critic_forward(x, a, params))
        assert q.shape == (batch, 1)

        # Reference 1: mirrors the kernel's bf16 operand rounding (incl. the
        # folded action/bias columns) -> tight check of the Pallas plumbing.
        def bf(v):
            return v.astype(jnp.bfloat16).astype(jnp.float32)

        ego = jnp.concatenate([x, a, jnp.ones((batch, 1), jnp.float32)], 1)
        w1f = jnp.concatenate([w1, b1.reshape(1, -1)], 0)
        h1m = jnp.maximum(jnp.dot(bf(ego), bf(w1f), precision=hi), 0.0)
        h2m = jnp.maximum(jnp.dot(bf(h1m), bf(w2), precision=hi) + b2, 0.0)
        q_mirror = jnp.dot(h2m, w3, precision=hi) + b3
        assert jnp.allclose(q, q_mirror, atol=1e-3, rtol=1e-3), "mirror mismatch"

        # Reference 2: pure f32 PyTorch-equivalent forward (loose tolerance —
        # only difference is bf16 rounding of the matmul operands).
        ego_f = jnp.concatenate([x, a], 1)
        h1r = jnp.maximum(jnp.dot(ego_f, w1, precision=hi) + b1, 0.0)
        h2r = jnp.maximum(jnp.dot(h1r, w2, precision=hi) + b2, 0.0)
        q_ref = jnp.dot(h2r, w3, precision=hi) + b3
        assert jnp.allclose(q, q_ref, atol=5e-2, rtol=5e-2), "f32 ref mismatch"

    run_and_check(8, k_small)     # small batch: single-tile grid path
    run_and_check(530, k_big)     # odd batch: 2 tiles, padded rows, megacore
    print("KERNEL_OK")
</pallas_src>

<mosaic_0001>
module attributes {stable_mosaic.version = 11 : i64} {
  func.func @critic_kernel(%arg0: i32, %arg1: memref<8x24xbf16, #tpu.memory_space<vmem>>, %arg2: memref<24x512xbf16, #tpu.memory_space<vmem>>, %arg3: memref<512x512xbf16, #tpu.memory_space<vmem>>, %arg4: memref<1x512xf32, #tpu.memory_space<vmem>>, %arg5: memref<1x512xf32, #tpu.memory_space<vmem>>, %arg6: memref<1x1xf32, #tpu.memory_space<vmem>>, %arg7: memref<8x1xf32, #tpu.memory_space<vmem>>) attributes {dimension_semantics = [#tpu.dimension_semantics<parallel>], iteration_bounds = array<i64: 1>, scalar_prefetch = 0 : i64, scratch_operands = 0 : i64, tpu.core_type = #tpu.core_type<tc>, window_params = [{transform_indices = @transform_0, window_bounds = array<i64: 8, 24>}, {pipeline_mode = #tpu.pipeline_mode<synchronous>, transform_indices = @transform_1, window_bounds = array<i64: 24, 512>}, {pipeline_mode = #tpu.pipeline_mode<synchronous>, transform_indices = @transform_2, window_bounds = array<i64: 512, 512>}, {pipeline_mode = #tpu.pipeline_mode<synchronous>, transform_indices = @transform_3, window_bounds = array<i64: 1, 512>}, {pipeline_mode = #tpu.pipeline_mode<synchronous>, transform_indices = @transform_4, window_bounds = array<i64: 1, 512>}, {pipeline_mode = #tpu.pipeline_mode<synchronous>, transform_indices = @transform_5, window_bounds = array<i64: 1, 1>}, {transform_indices = @transform_6, window_bounds = array<i64: 8, 1>}]} {
    %c0 = arith.constant 0 : index
    %c0_0 = arith.constant 0 : index
    %0 = vector.load %arg1[%c0, %c0_0] : memref<8x24xbf16, #tpu.memory_space<vmem>>, vector<8x24xbf16>
    %c0_1 = arith.constant 0 : index
    %c0_2 = arith.constant 0 : index
    %1 = vector.load %arg2[%c0_1, %c0_2] : memref<24x512xbf16, #tpu.memory_space<vmem>>, vector<24x512xbf16>
    %cst = arith.constant dense<0.000000e+00> : vector<8x512xf32>
    %2 = tpu.matmul %0, %1, %cst {dimension_numbers = #tpu.dot_dimension_numbers<[1], [0], [0], [1], [0, 0, 1, 1], [], []>} : vector<8x24xbf16>, vector<24x512xbf16>, vector<8x512xf32> -> vector<8x512xf32>
    %cst_3 = arith.constant 0.000000e+00 : f32
    %3 = vector.broadcast %cst_3 : f32 to vector<8x512xf32>
    %4 = arith.maximumf %2, %3 : vector<8x512xf32>
    %5 = arith.truncf %4 : vector<8x512xf32> to vector<8x512xbf16>
    %c0_4 = arith.constant 0 : index
    %c0_5 = arith.constant 0 : index
    %6 = vector.load %arg3[%c0_4, %c0_5] : memref<512x512xbf16, #tpu.memory_space<vmem>>, vector<512x512xbf16>
    %cst_6 = arith.constant dense<0.000000e+00> : vector<8x512xf32>
    %7 = tpu.matmul %5, %6, %cst_6 {dimension_numbers = #tpu.dot_dimension_numbers<[1], [0], [0], [1], [0, 0, 1, 1], [], []>} : vector<8x512xbf16>, vector<512x512xbf16>, vector<8x512xf32> -> vector<8x512xf32>
    %c0_7 = arith.constant 0 : index
    %c0_8 = arith.constant 0 : index
    %8 = vector.load %arg4[%c0_7, %c0_8] : memref<1x512xf32, #tpu.memory_space<vmem>>, vector<1x512xf32>
    %9 = vector.broadcast %8 : vector<1x512xf32> to vector<8x512xf32>
    %10 = arith.addf %7, %9 : vector<8x512xf32>
    %cst_9 = arith.constant 0.000000e+00 : f32
    %11 = vector.broadcast %cst_9 : f32 to vector<8x512xf32>
    %12 = arith.maximumf %10, %11 : vector<8x512xf32>
    %c0_10 = arith.constant 0 : index
    %c0_11 = arith.constant 0 : index
    %13 = vector.load %arg5[%c0_10, %c0_11] : memref<1x512xf32, #tpu.memory_space<vmem>>, vector<1x512xf32>
    %14 = vector.broadcast %13 : vector<1x512xf32> to vector<8x512xf32>
    %15 = arith.mulf %12, %14 : vector<8x512xf32>
    %cst_12 = arith.constant dense<0.000000e+00> : vector<8xf32>
    %16 = vector.multi_reduction <add>, %15, %cst_12 [1] : vector<8x512xf32> to vector<8xf32>
    %17 = vector.shape_cast %16 : vector<8xf32> to vector<8x1xf32>
    %c0_13 = arith.constant 0 : index
    %c0_14 = arith.constant 0 : index
    %18 = vector.load %arg6[%c0_13, %c0_14] : memref<1x1xf32, #tpu.memory_space<vmem>>, vector<1x1xf32>
    %19 = vector.broadcast %18 : vector<1x1xf32> to vector<8x1xf32>
    %20 = arith.addf %17, %19 : vector<8x1xf32>
    %c0_15 = arith.constant 0 : index
    %c0_16 = arith.constant 0 : index
    %21 = vector.load %arg7[%c0_15, %c0_16] : memref<8x1xf32, #tpu.memory_space<vmem>>, vector<8x1xf32>
    tpu.vector_store %arg7[%c0_15, %c0_16], %20 {strides = array<i32>} : memref<8x1xf32, #tpu.memory_space<vmem>>, vector<8x1xf32>,
    return
  }
  func.func @transform_0(%arg0: i32) -> (i32, i32) {
    %c0_i32 = arith.constant 0 : i32
    %c0_i32_0 = arith.constant 0 : i32
    return %arg0, %c0_i32 : i32, i32
  }
  func.func @transform_1(%arg0: i32) -> (i32, i32) {
    %c0_i32 = arith.constant 0 : i32
    %c0_i32_0 = arith.constant 0 : i32
    %c0_i32_1 = arith.constant 0 : i32
    return %c0_i32, %c0_i32_0 : i32, i32
  }
  func.func @transform_2(%arg0: i32) -> (i32, i32) {
    %c0_i32 = arith.constant 0 : i32
    %c0_i32_0 = arith.constant 0 : i32
    %c0_i32_1 = arith.constant 0 : i32
    return %c0_i32, %c0_i32_0 : i32, i32
  }
  func.func @transform_3(%arg0: i32) -> (i32, i32) {
    %c0_i32 = arith.constant 0 : i32
    %c0_i32_0 = arith.constant 0 : i32
    %c0_i32_1 = arith.constant 0 : i32
    return %c0_i32, %c0_i32_0 : i32, i32
  }
  func.func @transform_4(%arg0: i32) -> (i32, i32) {
    %c0_i32 = arith.constant 0 : i32
    %c0_i32_0 = arith.constant 0 : i32
    %c0_i32_1 = arith.constant 0 : i32
    return %c0_i32, %c0_i32_0 : i32, i32
  }
  func.func @transform_5(%arg0: i32) -> (i32, i32) {
    %c0_i32 = arith.constant 0 : i32
    %c0_i32_0 = arith.constant 0 : i32
    %c0_i32_1 = arith.constant 0 : i32
    return %c0_i32, %c0_i32_0 : i32, i32
  }
  func.func @transform_6(%arg0: i32) -> (i32, i32) {
    %c0_i32 = arith.constant 0 : i32
    %c0_i32_0 = arith.constant 0 : i32
    return %arg0, %c0_i32 : i32, i32
  }
}

</mosaic_0001>

<bundles_post_ra>
// kernel: tpu_custom_call.1
= control target key start
LH: loop header
LB: loop body
LE: loop exit
PB: predicated region body
PF: predicated region fallthrough
CT: control target
= control target key end

     0   :  { %s2089_s0 = inlined_call_operand.hbm [shape: bf16[8,24], index: 0, kind: input, shape index: {}]   ;;  %s2090_s1 = inlined_call_operand.hbm [shape: bf16[24,512], index: 1, kind: input, shape index: {}]   ;;  %s2091_s2 = inlined_call_operand.hbm [shape: bf16[512,512], index: 2, kind: input, shape index: {}]   ;;  %s2092_s3 = inlined_call_operand.vmem [shape: f32[1,512], index: 3, kind: input, shape index: {}]   ;;  %s2093_s4 = inlined_call_operand.hbm [shape: f32[1,512], index: 4, kind: input, shape index: {}]   ;;  %s2094_s5 = inlined_call_operand.<no memory space> [shape: f32[1,1], index: 5, kind: input, shape index: {}]   ;;  %s2095_s6 = inlined_call_operand.vmem [shape: f32[8,1], index: 6, kind: output, shape index: {}]  }
   0x1   :  { %v11_v0 = vstv %s2094_s5 }
   0x2   :  { %12 = vst [vmem:[#allocation2] sm:$0x1] %v11_v0 }
   0x3   :  { %13 = vsyncpa [#allocation4], 0 }
   0x4   :  { %14 = vsyncpa [#allocation6], 0  ;;  %s31_s25 = sshll.u32 %s2090_s1, 4  ;;  %s32_s25 = int_to_ptr.hbm [resolvable:$true] %s31_s25 }
   0x5   :  { %15 = vsyncpa [#allocation9], 0  ;;  %s1995_s26 = smov [#allocation5]   ;;  %s21_s30 = sshll.u32 %s2089_s0, 4  ;;  %s22_s30 = int_to_ptr.hbm [resolvable:$true] %s21_s30 }
   0x6   :  { %s33_s27 = sshll.u32 %s1995_s26, 4  ;;  %s1996_s7 = smov 256   ;;  %s34_s27 = int_to_ptr.vmem [resolvable:$true] %s33_s27 }
   0x7   :  { %s1997_s8 = smov 16   ;;  %s1998_s5 = smov [#allocation3]  }
   0x8   :  { %39 = dma.hbm_to_vmem [thread:$0]  %s32_s25, 768, %s34_s27, [#allocation6], %s1996_s7, %s1996_s7, %s1997_s8  }
   0x9   :  { %s23_s9 = sshll.u32 %s1998_s5, 4  ;;  %s44_s12 = sshll.u32 %s2091_s2, 4  ;;  %s24_s9 = int_to_ptr.vmem [resolvable:$true] %s23_s9  ;;  %s45_s12 = int_to_ptr.hbm [resolvable:$true] %s44_s12 }
   0xa   :  { %26 = dma.hbm_to_vmem [thread:$0]  %s22_s30, 64, %s24_s9, [#allocation4]  }
   0xb   :  { %s60_s14 = sshll.u32 %s2093_s4, 4  ;;  %s1999_s15 = smov [#allocation7]   ;;  %s61_s14 = int_to_ptr.hbm [resolvable:$true] %s60_s14 }
   0xc   :  { %s46_s16 = sshll.u32 %s1999_s15, 4  ;;  %s2000_s0 = smov [#allocation8]   ;;  %s47_s16 = int_to_ptr.vmem [resolvable:$true] %s46_s16 }
   0xd   :  { %52 = dma.hbm_to_vmem [thread:$0]  %s45_s12, 16384, %s47_s16, [#allocation6], %s1996_s7, %s1996_s7, %s1997_s8  }
   0xe   :  { %s62_s17 = sshll.u32 %s2000_s0, 4  ;;  %s63_s17 = int_to_ptr.vmem [resolvable:$true] %s62_s17 }
   0xf   :  { %65 = dma.hbm_to_vmem [thread:$0]  %s61_s14, 64, %s63_s17, [#allocation9]  }
  0x10   :  { %1989 = dma.done.wait [#allocation4], 64  }
  0x11   :  { %1990 = vsyncadd [#allocation4], 4294967232 }
  0x12   :  { %1991 = dma.done.wait [#allocation6], 17152  }
  0x13   :  { %1992 = vsyncadd [#allocation6], 4294950144 }
  0x14   :  { %1993 = dma.done.wait [#allocation9], 64  }
  0x15   :  { %1994 = vsyncadd [#allocation9], 4294967232  ;;  %v90_v1 = vld [vmem:[#allocation5 + $0x20] sm:$0xff]  ;;  %vm126_vm0 = vcmask 1043456   ;;  %v91_v2 = vld [vmem:[#allocation5 + $0x28] sm:$0xff]  ;;  %vm122_vm1 = vcmask 195584  }
  0x16   :  { %v106_v3 = vunpack.c.l.b16 %v90_v1  ;;  %v107_v4 = vunpack.c.h.b16 %v90_v1  ;;  %v108_v5 = vunpack.c.l.b16 %v91_v2  ;;  %v109_v6 = vunpack.c.h.b16 %v91_v2  ;;  %v1224_v7 = vld [vmem:[#allocation5] sm:$0xf]  ;;  %v1756_v8 = vld [vmem:[#allocation5 + $0xc] sm:$0xf0]  ;;  %v1754_v9 = vld [vmem:[#allocation5 + $0x4] sm:$0xf] }
  0x17   :  { %v1226_v10 = vld [vmem:[#allocation5 + $0x10] sm:$0xf0]  ;;  %v1232_v11 = vld [vmem:[#allocation5 + $0x8] sm:$0xf]  ;;  %v1757_v16 = vld [vmem:[#allocation5 + $0x14] sm:$0xf0]  ;;  %v1225_v27 = vor.u32 %v1756_v8, %v1224_v7 }
  0x18   :  { %v114_v12 = vpack.c.b16 %v106_v3, %v106_v3  ;;  %v115_v13 = vpack.c.b16 %v107_v4, %v107_v4  ;;  %v116_v14 = vpack.c.b16 %v108_v5, %v108_v5  ;;  %v117_v15 = vpack.c.b16 %v109_v6, %v109_v6  ;;  %v1755_v17 = vld [vmem:[#allocation5 + $0xc] sm:$0xf]  ;;  %v1234_v18 = vld [vmem:[#allocation5 + $0x18] sm:$0xf0]  ;;  %v1356_v19 = vld [vmem:[#allocation7 + $0xe0] sm:$0xf] }
  0x19   :  { %v1788_v20 = vld [vmem:[#allocation7 + $0xec] sm:$0xf0]  ;;  %v1484_v21 = vld [vmem:[#allocation7 + $0x1e0] sm:$0xf]  ;;  %v1229_v28 = vor.u32 %v1754_v9, %v1226_v10  ;;  %v1233_v29 = vor.u32 %v1757_v16, %v1232_v11  ;;  %v1237_v30 = vor.u32 %v1755_v17, %v1234_v18  ;;  %v85_v41 = vld [vmem:[#allocation3] sm:$0xf] }
  0x1a   :  { %v128_v22 = vsel %vm126_vm0, %v114_v12, 0  ;;  %v131_v23 = vsel %vm126_vm0, %v115_v13, 0  ;;  %v134_v24 = vsel %vm126_vm0, %v116_v14, 0  ;;  %v137_v25 = vsel %vm126_vm0, %v117_v15, 0  ;;  %v1820_v26 = vld [vmem:[#allocation7 + $0x1ec] sm:$0xf0] }
  0x1b   :  { %145 = vmatpush.bf16.msra.mxu0 %v128_v22  ;;  %158 = vmatpush.bf16.msra.mxu1 %v131_v23  ;;  %v1340_v31 = vld [vmem:[#allocation7 + $0xc0] sm:$0xf]  ;;  %v1357_v33 = vor.u32 %v1788_v20, %v1356_v19  ;;  %v1485_v34 = vor.u32 %v1820_v26, %v1484_v21  ;;  %v1852_v35 = vld [vmem:[#allocation7 + $0x2ec] sm:$0xf0]  ;;  %vm1213_vm2 = vcmask 7168  }
  0x1c   :  { %171 = vmatpush.bf16.msra.mxu2 %v134_v24  ;;  %184 = vmatpush.bf16.msra.mxu3 %v137_v25  ;;  %v1612_v32 = vld [vmem:[#allocation7 + $0x2e0] sm:$0xf]  ;;  %v1884_v37 = vld [vmem:[#allocation7 + $0x3ec] sm:$0xf0] }
  0x1d   :  { %v1740_v36 = vld [vmem:[#allocation7 + $0x3e0] sm:$0xf]  ;;  %v1784_v38 = vld [vmem:[#allocation7 + $0xcc] sm:$0xf0]  ;;  %v1613_v42 = vor.u32 %v1852_v35, %v1612_v32 }
  0x1e   :  { %v1468_v39 = vld [vmem:[#allocation7 + $0x1c0] sm:$0xf]  ;;  %v1816_v40 = vld [vmem:[#allocation7 + $0x1cc] sm:$0xf0]  ;;  %v1741_v43 = vor.u32 %v1884_v37, %v1740_v36  ;;  %v1341_v46 = vor.u32 %v1784_v38, %v1340_v31 }
  0x1f   :  { %146 = vmatpush.bf16.msra.mxu0 %v1225_v27  ;;  %159 = vmatpush.bf16.msra.mxu1 %v1229_v28  ;;  %v1324_v44 = vld [vmem:[#allocation7 + $0xa0] sm:$0xf]  ;;  %v1469_v47 = vor.u32 %v1816_v40, %v1468_v39  ;;  %v1848_v48 = vld [vmem:[#allocation7 + $0x2cc] sm:$0xf0] }
  0x20   :  { %172 = vmatpush.bf16.msra.mxu2 %v1233_v29  ;;  %185 = vmatpush.bf16.msra.mxu3 %v1237_v30  ;;  %v1596_v45 = vld [vmem:[#allocation7 + $0x2c0] sm:$0xf]  ;;  %v1880_v50 = vld [vmem:[#allocation7 + $0x3cc] sm:$0xf0] }
  0x21   :  { %v1724_v49 = vld [vmem:[#allocation7 + $0x3c0] sm:$0xf]  ;;  %v1780_v51 = vld [vmem:[#allocation7 + $0xac] sm:$0xf0]  ;;  %v1597_v54 = vor.u32 %v1848_v48, %v1596_v45 }
  0x22   :  { %1238 = vmatmul.msk.bf16.vlgmr.msra.gmra.mxu0 %vm122_vm1, %v85_v41  ;;  %1239 = vmatmul.msk.bf16.vlgmr.msra.gmra.mxu1 %vm122_vm1, %v85_v41  ;;  %v1452_v52 = vld [vmem:[#allocation7 + $0x1a0] sm:$0xf]  ;;  %v1812_v53 = vld [vmem:[#allocation7 + $0x1ac] sm:$0xf0]  ;;  %v1725_v55 = vor.u32 %v1880_v50, %v1724_v49  ;;  %v1325_v58 = vor.u32 %v1780_v51, %v1324_v44  ;;  %v1786_v50 = vld [vmem:[#allocation7 + $0xe4] sm:$0xf] }
  0x23   :  { %977 = vmatpush.bf16.msrb.mxu0 %v1357_v33  ;;  %990 = vmatpush.bf16.msrb.mxu1 %v1485_v34  ;;  %v1308_v56 = vld [vmem:[#allocation7 + $0x80] sm:$0xf]  ;;  %v1453_v59 = vor.u32 %v1812_v53, %v1452_v52  ;;  %v1844_v60 = vld [vmem:[#allocation7 + $0x2ac] sm:$0xf0]  ;;  %v1358_v51 = vld [vmem:[#allocation7 + $0xf0] sm:$0xf0] }
  0x24   :  { %1240 = vmatmul.msk.bf16.vlgmr.msra.gmra.mxu2 %vm122_vm1, %v85_v41  ;;  %1241 = vmatmul.msk.bf16.vlgmr.msra.gmra.mxu3 %vm122_vm1, %v85_v41  ;;  %v1580_v57 = vld [vmem:[#allocation7 + $0x2a0] sm:$0xf]  ;;  %v1876_v62 = vld [vmem:[#allocation7 + $0x3ac] sm:$0xf0]  ;;  %v1818_v52 = vld [vmem:[#allocation7 + $0x1e4] sm:$0xf] }
  0x25   :  { %1003 = vmatpush.bf16.msrb.mxu2 %v1613_v42  ;;  %1016 = vmatpush.bf16.msrb.mxu3 %v1741_v43  ;;  %v1708_v61 = vld [vmem:[#allocation7 + $0x3a0] sm:$0xf]  ;;  %v1776_v63 = vld [vmem:[#allocation7 + $0x8c] sm:$0xf0]  ;;  %v1581_v2 = vor.u32 %v1844_v60, %v1580_v57  ;;  %v1486_v53 = vld [vmem:[#allocation7 + $0x1f0] sm:$0xf0] }
  0x26   :  { %v1436_v0 = vld [vmem:[#allocation7 + $0x180] sm:$0xf]  ;;  %v1808_v1 = vld [vmem:[#allocation7 + $0x18c] sm:$0xf0]  ;;  %v1709_v3 = vor.u32 %v1876_v62, %v1708_v61  ;;  %v1309_v6 = vor.u32 %v1776_v63, %v1308_v56  ;;  %v1782_v60 = vld [vmem:[#allocation7 + $0xc4] sm:$0xf] }
  0x27   :  { %978 = vmatpush.bf16.msrb.mxu0 %v1341_v46  ;;  %991 = vmatpush.bf16.msrb.mxu1 %v1469_v47  ;;  %v1292_v4 = vld [vmem:[#allocation7 + $0x60] sm:$0xf]  ;;  %v1437_v7 = vor.u32 %v1808_v1, %v1436_v0  ;;  %v1840_v8 = vld [vmem:[#allocation7 + $0x28c] sm:$0xf0]  ;;  %v1850_v63 = vld [vmem:[#allocation7 + $0x2e4] sm:$0xf]  ;;  %v1361_v0 = vor.u32 %v1786_v50, %v1358_v51  ;;  %v1489_v1 = vor.u32 %v1818_v52, %v1486_v53 }
  0x28   :  { %v1564_v5 = vld [vmem:[#allocation7 + $0x280] sm:$0xf]  ;;  %v1872_v10 = vld [vmem:[#allocation7 + $0x38c] sm:$0xf0]  ;;  %v1550_v52 = vld [vmem:[#allocation7 + $0x270] sm:$0xf0] }
  0x29   :  { %1004 = vmatpush.bf16.msrb.mxu2 %v1597_v54  ;;  %1017 = vmatpush.bf16.msrb.mxu3 %v1725_v55  ;;  %v1692_v9 = vld [vmem:[#allocation7 + $0x380] sm:$0xf]  ;;  %v1772_v11 = vld [vmem:[#allocation7 + $0x6c] sm:$0xf0]  ;;  %v1565_v14 = vor.u32 %v1840_v8, %v1564_v5  ;;  %v1342_v5 = vld [vmem:[#allocation7 + $0xd0] sm:$0xf0] }
  0x2a   :  { %v1420_v12 = vld [vmem:[#allocation7 + $0x160] sm:$0xf]  ;;  %v1804_v13 = vld [vmem:[#allocation7 + $0x16c] sm:$0xf0]  ;;  %v1693_v15 = vor.u32 %v1872_v10, %v1692_v9  ;;  %v1293_v18 = vor.u32 %v1772_v11, %v1292_v4  ;;  %v1742_v4 = vld [vmem:[#allocation7 + $0x3f0] sm:$0xf0] }
  0x2b   :  { %979 = vmatpush.bf16.msrb.mxu0 %v1325_v58  ;;  %992 = vmatpush.bf16.msrb.mxu1 %v1453_v59  ;;  %v1276_v16 = vld [vmem:[#allocation7 + $0x40] sm:$0xf]  ;;  %v1421_v19 = vor.u32 %v1804_v13, %v1420_v12  ;;  %v1836_v20 = vld [vmem:[#allocation7 + $0x26c] sm:$0xf0]  ;;  %v1778_v12 = vld [vmem:[#allocation7 + $0xa4] sm:$0xf] }
  0x2c   :  { %v1548_v17 = vld [vmem:[#allocation7 + $0x260] sm:$0xf]  ;;  %v1868_v22 = vld [vmem:[#allocation7 + $0x36c] sm:$0xf0]  ;;  %v1846_v13 = vld [vmem:[#allocation7 + $0x2c4] sm:$0xf] }
  0x2d   :  { %1005 = vmatpush.bf16.msrb.mxu2 %v1581_v2  ;;  %1018 = vmatpush.bf16.msrb.mxu3 %v1709_v3  ;;  %v1676_v21 = vld [vmem:[#allocation7 + $0x360] sm:$0xf]  ;;  %v1768_v23 = vld [vmem:[#allocation7 + $0x4c] sm:$0xf0]  ;;  %v1549_v26 = vor.u32 %v1836_v20, %v1548_v17  ;;  %v1614_v2 = vld [vmem:[#allocation7 + $0x2f0] sm:$0xf0] }
  0x2e   :  { %v1404_v24 = vld [vmem:[#allocation7 + $0x140] sm:$0xf]  ;;  %v1800_v25 = vld [vmem:[#allocation7 + $0x14c] sm:$0xf0]  ;;  %v1677_v27 = vor.u32 %v1868_v22, %v1676_v21  ;;  %v1277_v30 = vor.u32 %v1768_v23, %v1276_v16  ;;  %v1882_v3 = vld [vmem:[#allocation7 + $0x3e4] sm:$0xf]  ;;  %v1617_v10 = vor.u32 %v1850_v63, %v1614_v2 }
  0x2f   :  { %980 = vmatpush.bf16.msrb.mxu0 %v1309_v6  ;;  %993 = vmatpush.bf16.msrb.mxu1 %v1437_v7  ;;  %v1260_v28 = vld [vmem:[#allocation7 + $0x20] sm:$0xf]  ;;  %v1405_v31 = vor.u32 %v1800_v25, %v1404_v24  ;;  %v1832_v32 = vld [vmem:[#allocation7 + $0x24c] sm:$0xf0]  ;;  %v1814_v6 = vld [vmem:[#allocation7 + $0x1c4] sm:$0xf]  ;;  %v1745_v11 = vor.u32 %v1882_v3, %v1742_v4 }
  0x30   :  { %v1532_v29 = vld [vmem:[#allocation7 + $0x240] sm:$0xf]  ;;  %v1864_v34 = vld [vmem:[#allocation7 + $0x34c] sm:$0xf0]  ;;  %v1470_v7 = vld [vmem:[#allocation7 + $0x1d0] sm:$0xf0] }
  0x31   :  { %1006 = vmatpush.bf16.msrb.mxu2 %v1565_v14  ;;  %1019 = vmatpush.bf16.msrb.mxu3 %v1693_v15  ;;  %v1660_v33 = vld [vmem:[#allocation7 + $0x340] sm:$0xf]  ;;  %v1764_v35 = vld [vmem:[#allocation7 + $0x2c] sm:$0xf0]  ;;  %v1533_v38 = vor.u32 %v1832_v32, %v1532_v29  ;;  %v1345_v14 = vor.u32 %v1782_v60, %v1342_v5  ;;  %v1473_v15 = vor.u32 %v1814_v6, %v1470_v7  ;;  %v1598_v16 = vld [vmem:[#allocation7 + $0x2d0] sm:$0xf0] }
  0x32   :  { %v1388_v36 = vld [vmem:[#allocation7 + $0x120] sm:$0xf]  ;;  %v1796_v37 = vld [vmem:[#allocation7 + $0x12c] sm:$0xf0]  ;;  %v1661_v39 = vor.u32 %v1864_v34, %v1660_v33  ;;  %v1261_v43 = vor.u32 %v1764_v35, %v1260_v28  ;;  %v1878_v17 = vld [vmem:[#allocation7 + $0x3c4] sm:$0xf]  ;;  %v1601_v22 = vor.u32 %v1846_v13, %v1598_v16 }
  0x33   :  { %981 = vmatpush.bf16.msrb.mxu0 %v1293_v18  ;;  %994 = vmatpush.bf16.msrb.mxu1 %v1421_v19  ;;  %v1244_v40 = vld [vmem:[#allocation7] sm:$0xf]  ;;  %v1760_v41 = vld [vmem:[#allocation7 + $0xc] sm:$0xf0]  ;;  %v1389_v44 = vor.u32 %v1796_v37, %v1388_v36  ;;  %v1726_v18 = vld [vmem:[#allocation7 + $0x3d0] sm:$0xf0] }
  0x34   :  { %v1516_v42 = vld [vmem:[#allocation7 + $0x220] sm:$0xf]  ;;  %v1828_v45 = vld [vmem:[#allocation7 + $0x22c] sm:$0xf0]  ;;  %v1245_v58 = vor.u32 %v1760_v41, %v1244_v40  ;;  %v1326_v19 = vld [vmem:[#allocation7 + $0xb0] sm:$0xf0]  ;;  %v1729_v23 = vor.u32 %v1878_v17, %v1726_v18 }
  0x35   :  { %1007 = vmatpush.bf16.msrb.mxu2 %v1549_v26  ;;  %1020 = vmatpush.bf16.msrb.mxu3 %v1677_v27  ;;  %v1644_v46 = vld [vmem:[#allocation7 + $0x320] sm:$0xf]  ;;  %v1860_v47 = vld [vmem:[#allocation7 + $0x32c] sm:$0xf0]  ;;  %v1517_v54 = vor.u32 %v1828_v45, %v1516_v42  ;;  %v1810_v20 = vld [vmem:[#allocation7 + $0x1a4] sm:$0xf]  ;;  %v1329_v26 = vor.u32 %v1778_v12, %v1326_v19 }
  0x36   :  { %v1372_v48 = vld [vmem:[#allocation7 + $0x100] sm:$0xf]  ;;  %v1792_v49 = vld [vmem:[#allocation7 + $0x10c] sm:$0xf0]  ;;  %v1645_v55 = vor.u32 %v1860_v47, %v1644_v46  ;;  %v1454_v21 = vld [vmem:[#allocation7 + $0x1b0] sm:$0xf0] }
  0x37   :  { %982 = vmatpush.bf16.msrb.mxu0 %v1277_v30  ;;  %995 = vmatpush.bf16.msrb.mxu1 %v1405_v31  ;;  %v1500_v56 = vld [vmem:[#allocation7 + $0x200] sm:$0xf]  ;;  %v1824_v57 = vld [vmem:[#allocation7 + $0x20c] sm:$0xf0]  ;;  %v1373_v59 = vor.u32 %v1792_v49, %v1372_v48  ;;  %v1774_v24 = vld [vmem:[#allocation7 + $0x84] sm:$0xf]  ;;  %v1457_v27 = vor.u32 %v1810_v20, %v1454_v21 }
  0x38   :  { %v1628_v61 = vld [vmem:[#allocation7 + $0x300] sm:$0xf]  ;;  %v1856_v62 = vld [vmem:[#allocation7 + $0x30c] sm:$0xf0]  ;;  %v1501_v8 = vor.u32 %v1824_v57, %v1500_v56  ;;  %v1842_v25 = vld [vmem:[#allocation7 + $0x2a4] sm:$0xf] }
  0x39   :  { %1008 = vmatpush.bf16.msrb.mxu2 %v1533_v38  ;;  %1021 = vmatpush.bf16.msrb.mxu3 %v1661_v39  ;;  %v1629_v9 = vor.u32 %v1856_v62, %v1628_v61  ;;  %v1582_v28 = vld [vmem:[#allocation7 + $0x2b0] sm:$0xf0]  ;;  %v1874_v29 = vld [vmem:[#allocation7 + $0x3a4] sm:$0xf] }
  0x3a   :  { %v1710_v30 = vld [vmem:[#allocation7 + $0x3b0] sm:$0xf0]  ;;  %v1806_v32 = vld [vmem:[#allocation7 + $0x184] sm:$0xf]  ;;  %v1585_v34 = vor.u32 %v1842_v25, %v1582_v28  ;;  %v1364_v28 = vld [vmem:[#allocation7 + $0xe8] sm:$0xf] }
  0x3b   :  { %983 = vmatpush.bf16.msrb.mxu0 %v1261_v43  ;;  %996 = vmatpush.bf16.msrb.mxu1 %v1389_v44  ;;  %v1310_v31 = vld [vmem:[#allocation7 + $0x90] sm:$0xf0]  ;;  %v1713_v35 = vor.u32 %v1874_v29, %v1710_v30  ;;  %v1770_v36 = vld [vmem:[#allocation7 + $0x64] sm:$0xf]  ;;  %v1789_v29 = vld [vmem:[#allocation7 + $0xf4] sm:$0xf0] }
  0x3c   :  { %v1438_v33 = vld [vmem:[#allocation7 + $0x190] sm:$0xf0]  ;;  %v1838_v37 = vld [vmem:[#allocation7 + $0x284] sm:$0xf]  ;;  %v1313_v38 = vor.u32 %v1774_v24, %v1310_v31  ;;  %v1492_v30 = vld [vmem:[#allocation7 + $0x1e8] sm:$0xf] }
  0x3d   :  { %1009 = vmatpush.bf16.msrb.mxu2 %v1517_v54  ;;  %1022 = vmatpush.bf16.msrb.mxu3 %v1645_v55  ;;  %v1441_v39 = vor.u32 %v1806_v32, %v1438_v33  ;;  %v1566_v40 = vld [vmem:[#allocation7 + $0x290] sm:$0xf0]  ;;  %v1870_v41 = vld [vmem:[#allocation7 + $0x384] sm:$0xf]  ;;  %v1821_v31 = vld [vmem:[#allocation7 + $0x1f4] sm:$0xf0] }
  0x3e   :  { %v1694_v42 = vld [vmem:[#allocation7 + $0x390] sm:$0xf0]  ;;  %v1802_v44 = vld [vmem:[#allocation7 + $0x164] sm:$0xf]  ;;  %v1569_v46 = vor.u32 %v1838_v37, %v1566_v40  ;;  %v1493_v37 = vor.u32 %v1821_v31, %v1492_v30 }
  0x3f   :  { %984 = vmatpush.bf16.msrb.mxu0 %v1245_v58  ;;  %997 = vmatpush.bf16.msrb.mxu1 %v1373_v59  ;;  %v1294_v43 = vld [vmem:[#allocation7 + $0x70] sm:$0xf0]  ;;  %v1697_v47 = vor.u32 %v1870_v41, %v1694_v42  ;;  %v1766_v48 = vld [vmem:[#allocation7 + $0x44] sm:$0xf]  ;;  %v1785_v41 = vld [vmem:[#allocation7 + $0xd4] sm:$0xf0] }
  0x40   :  { %v1422_v45 = vld [vmem:[#allocation7 + $0x170] sm:$0xf0]  ;;  %v1834_v49 = vld [vmem:[#allocation7 + $0x264] sm:$0xf]  ;;  %v1297_v50 = vor.u32 %v1770_v36, %v1294_v43  ;;  %v1365_v36 = vor.u32 %v1789_v29, %v1364_v28  ;;  %v1476_v42 = vld [vmem:[#allocation7 + $0x1c8] sm:$0xf] }
  0x41   :  { %1010 = vmatpush.bf16.msrb.mxu2 %v1501_v8  ;;  %1023 = vmatpush.bf16.msrb.mxu3 %v1629_v9  ;;  %v1425_v51 = vor.u32 %v1802_v44, %v1422_v45  ;;  %v1866_v53 = vld [vmem:[#allocation7 + $0x364] sm:$0xf]  ;;  %v1678_v54 = vld [vmem:[#allocation7 + $0x370] sm:$0xf0]  ;;  %v1553_v58 = vor.u32 %v1834_v49, %v1550_v52  ;;  %v1817_v43 = vld [vmem:[#allocation7 + $0x1d4] sm:$0xf0] }
  0x42   :  { %v1278_v55 = vld [vmem:[#allocation7 + $0x50] sm:$0xf0]  ;;  %v1798_v56 = vld [vmem:[#allocation7 + $0x144] sm:$0xf]  ;;  %v1681_v59 = vor.u32 %v1866_v53, %v1678_v54  ;;  %v1620_v44 = vld [vmem:[#allocation7 + $0x2e8] sm:$0xf] }
  0x43   :  { %1029 = vmatpush.bf16.msra.mxu0 %v1361_v0  ;;  %1042 = vmatpush.bf16.msra.mxu1 %v1489_v1  ;;  %v1406_v57 = vld [vmem:[#allocation7 + $0x150] sm:$0xf0]  ;;  %v1281_v60 = vor.u32 %v1766_v48, %v1278_v55  ;;  %v1762_v62 = vld [vmem:[#allocation7 + $0x24] sm:$0xf]  ;;  %v1853_v45 = vld [vmem:[#allocation7 + $0x2f4] sm:$0xf0]  ;;  %v1477_v48 = vor.u32 %v1817_v43, %v1476_v42 }
  0x44   :  { %v1409_v61 = vor.u32 %v1798_v56, %v1406_v57  ;;  %v1262_v63 = vld [vmem:[#allocation7 + $0x30] sm:$0xf0]  ;;  %v1794_v0 = vld [vmem:[#allocation7 + $0x124] sm:$0xf]  ;;  %v1885_v49 = vld [vmem:[#allocation7 + $0x3f4] sm:$0xf0] }
  0x45   :  { %1055 = vmatpush.bf16.msra.mxu2 %v1617_v10  ;;  %1068 = vmatpush.bf16.msra.mxu3 %v1745_v11  ;;  %v1265_v1 = vor.u32 %v1762_v62, %v1262_v63  ;;  %v1390_v2 = vld [vmem:[#allocation7 + $0x130] sm:$0xf0]  ;;  %v1830_v4 = vld [vmem:[#allocation7 + $0x244] sm:$0xf]  ;;  %v1460_v54 = vld [vmem:[#allocation7 + $0x1a8] sm:$0xf] }
  0x46   :  { %v1393_v3 = vor.u32 %v1794_v0, %v1390_v2  ;;  %v1534_v5 = vld [vmem:[#allocation7 + $0x250] sm:$0xf0]  ;;  %v1862_v6 = vld [vmem:[#allocation7 + $0x344] sm:$0xf]  ;;  %v1813_v55 = vld [vmem:[#allocation7 + $0x1b4] sm:$0xf0] }
  0x47   :  { %1030 = vmatpush.bf16.msra.mxu0 %v1345_v14  ;;  %1043 = vmatpush.bf16.msra.mxu1 %v1473_v15  ;;  %v1537_v7 = vor.u32 %v1830_v4, %v1534_v5  ;;  %v1662_v8 = vld [vmem:[#allocation7 + $0x350] sm:$0xf0]  ;;  %v1758_v10 = vld [vmem:[#allocation7 + $0x4] sm:$0xf]  ;;  %v1604_v63 = vld [vmem:[#allocation7 + $0x2c8] sm:$0xf] }
  0x48   :  { %v1665_v9 = vor.u32 %v1862_v6, %v1662_v8  ;;  %v1246_v11 = vld [vmem:[#allocation7 + $0x10] sm:$0xf0]  ;;  %v1790_v12 = vld [vmem:[#allocation7 + $0x104] sm:$0xf]  ;;  %v1849_v0 = vld [vmem:[#allocation7 + $0x2d4] sm:$0xf0] }
  0x49   :  { %1056 = vmatpush.bf16.msra.mxu2 %v1601_v22  ;;  %1069 = vmatpush.bf16.msra.mxu3 %v1729_v23  ;;  %v1249_v13 = vor.u32 %v1758_v10, %v1246_v11  ;;  %v1374_v14 = vld [vmem:[#allocation7 + $0x110] sm:$0xf0]  ;;  %v1826_v16 = vld [vmem:[#allocation7 + $0x224] sm:$0xf]  ;;  %v1732_v4 = vld [vmem:[#allocation7 + $0x3c8] sm:$0xf]  ;;  %v1605_v10 = vor.u32 %v1849_v0, %v1604_v63 }
  0x4a   :  { %v1377_v15 = vor.u32 %v1790_v12, %v1374_v14  ;;  %v1518_v17 = vld [vmem:[#allocation7 + $0x230] sm:$0xf0]  ;;  %v1858_v18 = vld [vmem:[#allocation7 + $0x324] sm:$0xf]  ;;  %v1881_v5 = vld [vmem:[#allocation7 + $0x3d4] sm:$0xf0] }
  0x4b   :  { %1031 = vmatpush.bf16.msra.mxu0 %v1329_v26  ;;  %1044 = vmatpush.bf16.msra.mxu1 %v1457_v27  ;;  %v1646_v19 = vld [vmem:[#allocation7 + $0x330] sm:$0xf0]  ;;  %v1521_v20 = vor.u32 %v1826_v16, %v1518_v17  ;;  %v1822_v22 = vld [vmem:[#allocation7 + $0x204] sm:$0xf]  ;;  %v1316_v6 = vld [vmem:[#allocation7 + $0x88] sm:$0xf]  ;;  %v1733_v11 = vor.u32 %v1881_v5, %v1732_v4 }
  0x4c   :  { %v1649_v21 = vor.u32 %v1858_v18, %v1646_v19  ;;  %v1502_v23 = vld [vmem:[#allocation7 + $0x210] sm:$0xf0]  ;;  %v1854_v25 = vld [vmem:[#allocation7 + $0x304] sm:$0xf]  ;;  %v1444_v8 = vld [vmem:[#allocation7 + $0x188] sm:$0xf] }
  0x4d   :  { %1057 = vmatpush.bf16.msra.mxu2 %v1585_v34  ;;  %1070 = vmatpush.bf16.msra.mxu3 %v1713_v35  ;;  %v1505_v24 = vor.u32 %v1822_v22, %v1502_v23  ;;  %v1630_v26 = vld [vmem:[#allocation7 + $0x310] sm:$0xf0]  ;;  %v1588_v12 = vld [vmem:[#allocation7 + $0x2a8] sm:$0xf]  ;;  %v1877_v17 = vld [vmem:[#allocation7 + $0x3b4] sm:$0xf0] }
  0x4e   :  { %v1633_v27 = vor.u32 %v1854_v25, %v1630_v26  ;;  %v1716_v16 = vld [vmem:[#allocation7 + $0x3a8] sm:$0xf]  ;;  %v1805_v23 = vld [vmem:[#allocation7 + $0x174] sm:$0xf0]  ;;  %v1366_v63 = vld [vmem:[#allocation7 + $0xf8] sm:$0xf0] }
  0x4f   :  { %1032 = vmatpush.bf16.msra.mxu0 %v1313_v38  ;;  %1045 = vmatpush.bf16.msra.mxu1 %v1441_v39  ;;  %v1348_v38 = vld [vmem:[#allocation7 + $0xc8] sm:$0xf]  ;;  %v1717_v25 = vor.u32 %v1877_v17, %v1716_v16  ;;  %v1873_v29 = vld [vmem:[#allocation7 + $0x394] sm:$0xf0]  ;;  %v1819_v4 = vld [vmem:[#allocation7 + $0x1ec] sm:$0xf] }
  0x50   :  { %v1428_v22 = vld [vmem:[#allocation7 + $0x168] sm:$0xf]  ;;  %v1869_v43 = vld [vmem:[#allocation7 + $0x374] sm:$0xf0]  ;;  %v1494_v5 = vld [vmem:[#allocation7 + $0x1f8] sm:$0xf0] }
  0x51   :  { %1058 = vmatpush.bf16.msra.mxu2 %v1569_v46  ;;  %1071 = vmatpush.bf16.msra.mxu3 %v1697_v47  ;;  %v1748_v46 = vld [vmem:[#allocation7 + $0x3e8] sm:$0xf]  ;;  %v1349_v47 = vor.u32 %v1785_v41, %v1348_v38  ;;  %v1429_v31 = vor.u32 %v1805_v23, %v1428_v22  ;;  %v1837_v41 = vld [vmem:[#allocation7 + $0x274] sm:$0xf0]  ;;  %v1815_v16 = vld [vmem:[#allocation7 + $0x1cc] sm:$0xf] }
  0x52   :  { %v1572_v26 = vld [vmem:[#allocation7 + $0x288] sm:$0xf]  ;;  %v1857_v23 = vld [vmem:[#allocation7 + $0x314] sm:$0xf0] }
  0x53   :  { %1033 = vmatpush.bf16.msra.mxu0 %v1297_v50  ;;  %1046 = vmatpush.bf16.msra.mxu1 %v1425_v51  ;;  %v1332_v50 = vld [vmem:[#allocation7 + $0xa8] sm:$0xf]  ;;  %v1781_v51 = vld [vmem:[#allocation7 + $0xb4] sm:$0xf0] }
  0x54   :  { %v1333_v62 = vor.u32 %v1781_v51, %v1332_v50  ;;  %v1700_v28 = vld [vmem:[#allocation7 + $0x388] sm:$0xf] }
  0x55   :  { %1059 = vmatpush.bf16.msra.mxu2 %v1553_v58  ;;  %1072 = vmatpush.bf16.msra.mxu3 %v1681_v59  ;;  %v1556_v38 = vld [vmem:[#allocation7 + $0x268] sm:$0xf] }
  0x56   :  { %v1684_v42 = vld [vmem:[#allocation7 + $0x368] sm:$0xf]  ;;  %v1557_v50 = vor.u32 %v1837_v41, %v1556_v38  ;;  %v1847_v38 = vld [vmem:[#allocation7 + $0x2cc] sm:$0xf]  ;;  %v1606_v41 = vld [vmem:[#allocation7 + $0x2d8] sm:$0xf0] }
  0x57   :  { %1034 = vmatpush.bf16.msra.mxu0 %v1281_v60  ;;  %1047 = vmatpush.bf16.msra.mxu1 %v1409_v61  ;;  %v1621_v60 = vor.u32 %v1853_v45, %v1620_v44  ;;  %v1749_v61 = vor.u32 %v1885_v49, %v1748_v46  ;;  %v1268_v46 = vld [vmem:[#allocation7 + $0x28] sm:$0xf]  ;;  %v1797_v49 = vld [vmem:[#allocation7 + $0x134] sm:$0xf0]  ;;  %v1685_v51 = vor.u32 %v1869_v43, %v1684_v42  ;;  %v1879_v42 = vld [vmem:[#allocation7 + $0x3cc] sm:$0xf] }
  0x58   :  { %v1636_v22 = vld [vmem:[#allocation7 + $0x308] sm:$0xf]  ;;  %v1734_v43 = vld [vmem:[#allocation7 + $0x3d8] sm:$0xf0] }
  0x59   :  { %1060 = vmatpush.bf16.msra.mxu2 %v1537_v7  ;;  %1073 = vmatpush.bf16.msra.mxu3 %v1665_v9  ;;  %v1777_v7 = vld [vmem:[#allocation7 + $0x94] sm:$0xf0] }
  0x5a   :  { %v1809_v9 = vld [vmem:[#allocation7 + $0x194] sm:$0xf0] }
  0x5b   :  { %1035 = vmatpush.bf16.msra.mxu0 %v1265_v1  ;;  %1048 = vmatpush.bf16.msra.mxu1 %v1393_v3  ;;  %v1461_v3 = vor.u32 %v1813_v55, %v1460_v54  ;;  %v1445_v14 = vor.u32 %v1809_v9, %v1444_v8  ;;  %v1668_v54 = vld [vmem:[#allocation7 + $0x348] sm:$0xf]  ;;  %v1865_v55 = vld [vmem:[#allocation7 + $0x354] sm:$0xf0] }
  0x5c   :  { %v1652_v8 = vld [vmem:[#allocation7 + $0x328] sm:$0xf]  ;;  %v1861_v9 = vld [vmem:[#allocation7 + $0x334] sm:$0xf0] }
  0x5d   :  { %1061 = vmatpush.bf16.msra.mxu2 %v1521_v20  ;;  %1074 = vmatpush.bf16.msra.mxu3 %v1649_v21  ;;  %v1300_v20 = vld [vmem:[#allocation7 + $0x68] sm:$0xf]  ;;  %v1773_v21 = vld [vmem:[#allocation7 + $0x74] sm:$0xf0] }
  0x5e   :  { %v1301_v30 = vor.u32 %v1773_v21, %v1300_v20  ;;  %v1508_v20 = vld [vmem:[#allocation7 + $0x208] sm:$0xf]  ;;  %v1825_v21 = vld [vmem:[#allocation7 + $0x214] sm:$0xf0] }
  0x5f   :  { %1036 = vmatpush.bf16.msra.mxu0 %v1249_v13  ;;  %1049 = vmatpush.bf16.msra.mxu1 %v1377_v15  ;;  %v1317_v13 = vor.u32 %v1777_v7, %v1316_v6  ;;  %v1845_v15 = vld [vmem:[#allocation7 + $0x2b4] sm:$0xf0]  ;;  %v1524_v6 = vld [vmem:[#allocation7 + $0x228] sm:$0xf] }
  0x60   :  { %v1829_v7 = vld [vmem:[#allocation7 + $0x234] sm:$0xf0] }
  0x61   :  { %1062 = vmatpush.bf16.msra.mxu2 %v1505_v24  ;;  %1075 = vmatpush.bf16.msra.mxu3 %v1633_v27  ;;  %v1589_v24 = vor.u32 %v1845_v15, %v1588_v12  ;;  %v1841_v27 = vld [vmem:[#allocation7 + $0x294] sm:$0xf0]  ;;  %v1350_v15 = vld [vmem:[#allocation7 + $0xd8] sm:$0xf0]  ;;  %v1525_v17 = vor.u32 %v1829_v7, %v1524_v6 }
  0x9f   :  { %v148_v32 = vpop.f32.mrf.mxu0  ;;  %v161_v33 = vpop.f32.mrf.mxu1 }
  0xa0   :  { %v191_v34 = vmax.f32 %v148_v32, 0.0  ;;  %v192_v35 = vmax.f32 %v161_v33, 0.0  ;;  %v1284_v32 = vld [vmem:[#allocation7 + $0x48] sm:$0xf]  ;;  %v1769_v33 = vld [vmem:[#allocation7 + $0x54] sm:$0xf0] }
  0xa1   :  { %v1285_v44 = vor.u32 %v1769_v33, %v1284_v32  ;;  %v1637_v32 = vor.u32 %v1857_v23, %v1636_v22  ;;  %v1334_v33 = vld [vmem:[#allocation7 + $0xb8] sm:$0xf0]  ;;  %v1795_v22 = vld [vmem:[#allocation7 + $0x12c] sm:$0xf] }
  0xa2   :  { %v2059_v39 = vpack.c.bf16 %v191_v34, %v191_v34  ;;  %v2061_v40 = vpack.c.bf16 %v192_v35, %v192_v35  ;;  %v1412_v34 = vld [vmem:[#allocation7 + $0x148] sm:$0xf]  ;;  %v1801_v35 = vld [vmem:[#allocation7 + $0x154] sm:$0xf0]  ;;  %v1398_v23 = vld [vmem:[#allocation7 + $0x138] sm:$0xf0] }
  0xa3   :  { %v1413_v45 = vor.u32 %v1801_v35, %v1412_v34  ;;  %v1811_v34 = vld [vmem:[#allocation7 + $0x1ac] sm:$0xf]  ;;  %v1462_v35 = vld [vmem:[#allocation7 + $0x1b8] sm:$0xf0] }
  0xa4   :  { %985 = vmatmul.bf16.vlgmr.msrb.gmra.mxu0 %v2059_v39  ;;  %998 = vmatmul.bf16.vlgmr.msrb.gmra.mxu1 %v2061_v40 }
  0xa5   :  { %1081 = vmatpush.bf16.msrb.mxu0 %v1365_v36  ;;  %1094 = vmatpush.bf16.msrb.mxu1 %v1493_v37  ;;  %v1573_v36 = vor.u32 %v1841_v27, %v1572_v26  ;;  %v1701_v37 = vor.u32 %v1873_v29, %v1700_v28  ;;  %v1883_v26 = vld [vmem:[#allocation7 + $0x3ec] sm:$0xf]  ;;  %v1750_v27 = vld [vmem:[#allocation7 + $0x3f8] sm:$0xf0] }
  0xa7   :  { %v174_v52 = vpop.f32.mrf.mxu2  ;;  %v187_v53 = vpop.f32.mrf.mxu3 }
  0xa8   :  { %v193_v56 = vmax.f32 %v174_v52, 0.0  ;;  %v194_v57 = vmax.f32 %v187_v53, 0.0  ;;  %v150_v58 = vpop.f32.mrf.mxu0  ;;  %v163_v59 = vpop.f32.mrf.mxu1  ;;  %v1540_v52 = vld [vmem:[#allocation7 + $0x248] sm:$0xf]  ;;  %v1833_v53 = vld [vmem:[#allocation7 + $0x254] sm:$0xf0] }
  0xa9   :  { %1082 = vmatpush.bf16.msrb.mxu0 %v1349_v47  ;;  %1095 = vmatpush.bf16.msrb.mxu1 %v1477_v48  ;;  %v1765_v47 = vld [vmem:[#allocation7 + $0x34] sm:$0xf0]  ;;  %v1396_v48 = vld [vmem:[#allocation7 + $0x128] sm:$0xf]  ;;  %v1541_v0 = vor.u32 %v1833_v53, %v1540_v52  ;;  %v1843_v52 = vld [vmem:[#allocation7 + $0x2ac] sm:$0xf] }
  0xaa   :  { %v2065_v1 = vpack.c.bf16 %v193_v56, %v193_v56  ;;  %v2067_v2 = vpack.c.bf16 %v194_v57, %v194_v57  ;;  %v1269_v56 = vor.u32 %v1765_v47, %v1268_v46  ;;  %v1397_v57 = vor.u32 %v1797_v49, %v1396_v48  ;;  %v1252_v58 = vld [vmem:[#allocation7 + $0x8] sm:$0xf]  ;;  %v1761_v59 = vld [vmem:[#allocation7 + $0x14] sm:$0xf0]  ;;  %v1775_v46 = vld [vmem:[#allocation7 + $0x8c] sm:$0xf] }
  0xab   :  { %v1318_v47 = vld [vmem:[#allocation7 + $0x98] sm:$0xf0]  ;;  %v1807_v48 = vld [vmem:[#allocation7 + $0x18c] sm:$0xf] }
  0xac   :  { %1011 = vmatmul.bf16.vlgmr.msrb.gmra.mxu2 %v2065_v1  ;;  %1024 = vmatmul.bf16.vlgmr.msrb.gmra.mxu3 %v2067_v2  ;;  %v1446_v49 = vld [vmem:[#allocation7 + $0x198] sm:$0xf0] }
  0xad   :  { %1107 = vmatpush.bf16.msrb.mxu2 %v1621_v60  ;;  %1120 = vmatpush.bf16.msrb.mxu3 %v1749_v61  ;;  %v1380_v60 = vld [vmem:[#allocation7 + $0x108] sm:$0xf]  ;;  %v1793_v61 = vld [vmem:[#allocation7 + $0x114] sm:$0xf0]  ;;  %v1590_v53 = vld [vmem:[#allocation7 + $0x2b8] sm:$0xf0] }
  0xae   :  { %1083 = vmatpush.bf16.msrb.mxu0 %v1333_v62  ;;  %1096 = vmatpush.bf16.msrb.mxu1 %v1461_v3  ;;  %v1787_v62 = vld [vmem:[#allocation7 + $0xec] sm:$0xf]  ;;  %v1669_v3 = vor.u32 %v1865_v55, %v1668_v54  ;;  %v1718_v55 = vld [vmem:[#allocation7 + $0x3b8] sm:$0xf0] }
  0xaf   :  { %v176_v18 = vpop.f32.mrf.mxu2  ;;  %v189_v19 = vpop.f32.mrf.mxu3  ;;  %v1369_v12 = vor.u32 %v1787_v62, %v1366_v63  ;;  %v1875_v54 = vld [vmem:[#allocation7 + $0x3ac] sm:$0xf]  ;;  %v1593_v62 = vor.u32 %v1843_v52, %v1590_v53 }
  0xb0   :  { %v1653_v18 = vor.u32 %v1861_v9, %v1652_v8  ;;  %v1478_v19 = vld [vmem:[#allocation7 + $0x1d8] sm:$0xf0]  ;;  %v1721_v63 = vor.u32 %v1875_v54, %v1718_v55  ;;  %v1767_v8 = vld [vmem:[#allocation7 + $0x4c] sm:$0xf] }
  0xb1   :  { %1108 = vmatpush.bf16.msrb.mxu2 %v1605_v10  ;;  %1121 = vmatpush.bf16.msrb.mxu3 %v1733_v11  ;;  %v1253_v10 = vor.u32 %v1761_v59, %v1252_v58  ;;  %v1381_v11 = vor.u32 %v1793_v61, %v1380_v60  ;;  %v1481_v29 = vor.u32 %v1815_v16, %v1478_v19  ;;  %v1771_v58 = vld [vmem:[#allocation7 + $0x6c] sm:$0xf]  ;;  %v1302_v59 = vld [vmem:[#allocation7 + $0x78] sm:$0xf0] }
  0xb2   :  { %1084 = vmatpush.bf16.msrb.mxu0 %v1317_v13  ;;  %1097 = vmatpush.bf16.msrb.mxu1 %v1445_v14  ;;  %v1497_v13 = vor.u32 %v1819_v4, %v1494_v5  ;;  %v1783_v14 = vld [vmem:[#allocation7 + $0xcc] sm:$0xf]  ;;  %v1430_v61 = vld [vmem:[#allocation7 + $0x178] sm:$0xf0]  ;;  %v1305_v6 = vor.u32 %v1771_v58, %v1302_v59 }
  0xb3   :  { %v1353_v28 = vor.u32 %v1783_v14, %v1350_v15  ;;  %v1803_v60 = vld [vmem:[#allocation7 + $0x16c] sm:$0xf]  ;;  %v1702_v5 = vld [vmem:[#allocation7 + $0x398] sm:$0xf0] }
  0xb4   :  { %1037 = vmatmul.bf16.vlgmr.msra.gmra.mxu0 %v2059_v39  ;;  %1050 = vmatmul.bf16.vlgmr.msra.gmra.mxu1 %v2061_v40  ;;  %v1871_v4 = vld [vmem:[#allocation7 + $0x38c] sm:$0xf]  ;;  %v1433_v7 = vor.u32 %v1803_v60, %v1430_v61  ;;  %v1286_v9 = vld [vmem:[#allocation7 + $0x58] sm:$0xf0] }
  0xb5   :  { %1109 = vmatpush.bf16.msrb.mxu2 %v1589_v24  ;;  %1122 = vmatpush.bf16.msrb.mxu3 %v1717_v25  ;;  %v1851_v24 = vld [vmem:[#allocation7 + $0x2ec] sm:$0xf]  ;;  %v1622_v25 = vld [vmem:[#allocation7 + $0x2f8] sm:$0xf0] }
  0xb6   :  { %1085 = vmatpush.bf16.msrb.mxu0 %v1301_v30  ;;  %1098 = vmatpush.bf16.msrb.mxu1 %v1429_v31  ;;  %v1779_v30 = vld [vmem:[#allocation7 + $0xac] sm:$0xf]  ;;  %v1509_v31 = vor.u32 %v1825_v21, %v1508_v20  ;;  %v1558_v15 = vld [vmem:[#allocation7 + $0x278] sm:$0xf0] }
  0xb7   :  { %v1835_v14 = vld [vmem:[#allocation7 + $0x26c] sm:$0xf]  ;;  %v1270_v21 = vld [vmem:[#allocation7 + $0x38] sm:$0xf0] }
  0xb8   :  { %v1867_v16 = vld [vmem:[#allocation7 + $0x36c] sm:$0xf] }
  0xb9   :  { %1110 = vmatpush.bf16.msrb.mxu2 %v1573_v36  ;;  %1123 = vmatpush.bf16.msrb.mxu3 %v1701_v37  ;;  %v1625_v36 = vor.u32 %v1851_v24, %v1622_v25  ;;  %v1753_v37 = vor.u32 %v1883_v26, %v1750_v27  ;;  %v1763_v20 = vld [vmem:[#allocation7 + $0x2c] sm:$0xf]  ;;  %v1561_v24 = vor.u32 %v1835_v14, %v1558_v15  ;;  %v1542_v27 = vld [vmem:[#allocation7 + $0x258] sm:$0xf0] }
  0xba   :  { %1086 = vmatpush.bf16.msrb.mxu0 %v1285_v44  ;;  %1099 = vmatpush.bf16.msrb.mxu1 %v1413_v45  ;;  %v1337_v44 = vor.u32 %v1779_v30, %v1334_v33  ;;  %v1465_v45 = vor.u32 %v1811_v34, %v1462_v35  ;;  %v1831_v26 = vld [vmem:[#allocation7 + $0x24c] sm:$0xf]  ;;  %v1273_v30 = vor.u32 %v1763_v20, %v1270_v21  ;;  %v1254_v33 = vld [vmem:[#allocation7 + $0x18] sm:$0xf0] }
  0xbb   :  { %v1791_v34 = vld [vmem:[#allocation7 + $0x10c] sm:$0xf]  ;;  %v1382_v35 = vld [vmem:[#allocation7 + $0x118] sm:$0xf0] }
  0xbc   :  { %1063 = vmatmul.bf16.vlgmr.msra.gmra.mxu2 %v2065_v1  ;;  %1076 = vmatmul.bf16.vlgmr.msra.gmra.mxu3 %v2067_v2  ;;  %v327_v54 = vld [vmem:[%s2092_s3] sm:$0xf] }
  0xbd   :  { %1111 = vmatpush.bf16.msrb.mxu2 %v1557_v50  ;;  %1124 = vmatpush.bf16.msrb.mxu3 %v1685_v51  ;;  %v1609_v50 = vor.u32 %v1847_v38, %v1606_v41  ;;  %v1737_v51 = vor.u32 %v1879_v42, %v1734_v43  ;;  %v1827_v38 = vld [vmem:[#allocation7 + $0x22c] sm:$0xf]  ;;  %v1526_v41 = vld [vmem:[#allocation7 + $0x238] sm:$0xf0]  ;;  %v329_v55 = vperm.slane %v327_v54, 0  ;;  %v330_v14 = vperm.slane %v327_v54, 1 }
  0xbe   :  { %1087 = vmatpush.bf16.msrb.mxu0 %v1269_v56  ;;  %1100 = vmatpush.bf16.msrb.mxu1 %v1397_v57  ;;  %v1321_v56 = vor.u32 %v1775_v46, %v1318_v47  ;;  %v1449_v57 = vor.u32 %v1807_v48, %v1446_v49  ;;  %v1859_v42 = vld [vmem:[#allocation7 + $0x32c] sm:$0xf]  ;;  %v1654_v43 = vld [vmem:[#allocation7 + $0x338] sm:$0xf0]  ;;  %v1529_v46 = vor.u32 %v1827_v38, %v1526_v41 }
  0xbf   :  { %v1657_v47 = vor.u32 %v1859_v42, %v1654_v43  ;;  %v1823_v48 = vld [vmem:[#allocation7 + $0x20c] sm:$0xf]  ;;  %v1510_v49 = vld [vmem:[#allocation7 + $0x218] sm:$0xf0] }
  0xc0   :  { %v1513_v52 = vor.u32 %v1823_v48, %v1510_v49 }
  0xc1   :  { %1112 = vmatpush.bf16.msrb.mxu2 %v1541_v0  ;;  %1125 = vmatpush.bf16.msrb.mxu3 %v1669_v3  ;;  %v1839_v0 = vld [vmem:[#allocation7 + $0x28c] sm:$0xf]  ;;  %v1574_v3 = vld [vmem:[#allocation7 + $0x298] sm:$0xf0] }
  0xc2   :  { %1088 = vmatpush.bf16.msrb.mxu0 %v1253_v10  ;;  %1101 = vmatpush.bf16.msrb.mxu1 %v1381_v11  ;;  %v1799_v10 = vld [vmem:[#allocation7 + $0x14c] sm:$0xf]  ;;  %v1414_v11 = vld [vmem:[#allocation7 + $0x158] sm:$0xf0] }
  0xc3   :  { %v1417_v19 = vor.u32 %v1799_v10, %v1414_v11 }
  0xc5   :  { %1113 = vmatpush.bf16.msrb.mxu2 %v1525_v17  ;;  %1126 = vmatpush.bf16.msrb.mxu3 %v1653_v18  ;;  %v1686_v17 = vld [vmem:[#allocation7 + $0x378] sm:$0xf0]  ;;  %v1289_v18 = vor.u32 %v1767_v8, %v1286_v9 }
  0xc6   :  { %1133 = vmatpush.bf16.msra.mxu0 %v1369_v12  ;;  %1146 = vmatpush.bf16.msra.mxu1 %v1497_v13  ;;  %v1577_v12 = vor.u32 %v1839_v0, %v1574_v3  ;;  %v1705_v13 = vor.u32 %v1871_v4, %v1702_v5  ;;  %v1689_v25 = vor.u32 %v1867_v16, %v1686_v17  ;;  %v331_v17 = vperm.slane %v327_v54, 2 }
  0xc7   :  { %1089 = vmatmul.bf16.vlgmr.msrb.gmra.mxu0 %v2059_v39  ;;  %1102 = vmatmul.bf16.vlgmr.msrb.gmra.mxu1 %v2061_v40 }
  0xc9   :  { %1114 = vmatpush.bf16.msrb.mxu2 %v1509_v31  ;;  %1127 = vmatpush.bf16.msrb.mxu3 %v1637_v32  ;;  %v1401_v31 = vor.u32 %v1795_v22, %v1398_v23  ;;  %v1759_v32 = vld [vmem:[#allocation7 + $0xc] sm:$0xf] }
  0xca   :  { %1134 = vmatpush.bf16.msra.mxu0 %v1353_v28  ;;  %1147 = vmatpush.bf16.msra.mxu1 %v1481_v29  ;;  %v1863_v28 = vld [vmem:[#allocation7 + $0x34c] sm:$0xf]  ;;  %v1670_v29 = vld [vmem:[#allocation7 + $0x358] sm:$0xf0] }
  0xcc   :  { %1115 = vmatmul.bf16.vlgmr.msrb.gmra.mxu2 %v2065_v1  ;;  %1128 = vmatmul.bf16.vlgmr.msrb.gmra.mxu3 %v2067_v2 }
  0xcd   :  { %1159 = vmatpush.bf16.msra.mxu2 %v1625_v36  ;;  %1172 = vmatpush.bf16.msra.mxu3 %v1753_v37  ;;  %v1545_v36 = vor.u32 %v1831_v26, %v1542_v27  ;;  %v1673_v37 = vor.u32 %v1863_v28, %v1670_v29  ;;  %v332_v27 = vperm.slane %v327_v54, 3 }
  0xce   :  { %1135 = vmatpush.bf16.msra.mxu0 %v1337_v44  ;;  %1148 = vmatpush.bf16.msra.mxu1 %v1465_v45  ;;  %v1257_v44 = vor.u32 %v1759_v32, %v1254_v33  ;;  %v1385_v45 = vor.u32 %v1791_v34, %v1382_v35 }
  0xd1   :  { %1160 = vmatpush.bf16.msra.mxu2 %v1609_v50  ;;  %1173 = vmatpush.bf16.msra.mxu3 %v1737_v51  ;;  %v1855_v50 = vld [vmem:[#allocation7 + $0x30c] sm:$0xf]  ;;  %v1638_v51 = vld [vmem:[#allocation7 + $0x318] sm:$0xf0] }
  0xd2   :  { %1136 = vmatpush.bf16.msra.mxu0 %v1321_v56  ;;  %1149 = vmatpush.bf16.msra.mxu1 %v1449_v57  ;;  %v1641_v53 = vor.u32 %v1855_v50, %v1638_v51 }
  0xd5   :  { %1161 = vmatpush.bf16.msra.mxu2 %v1593_v62  ;;  %1174 = vmatpush.bf16.msra.mxu3 %v1721_v63 }
  0xd6   :  { %1137 = vmatpush.bf16.msra.mxu0 %v1305_v6  ;;  %1150 = vmatpush.bf16.msra.mxu1 %v1433_v7 }
  0xd9   :  { %1162 = vmatpush.bf16.msra.mxu2 %v1577_v12  ;;  %1175 = vmatpush.bf16.msra.mxu3 %v1705_v13 }
  0xda   :  { %1138 = vmatpush.bf16.msra.mxu0 %v1289_v18  ;;  %1151 = vmatpush.bf16.msra.mxu1 %v1417_v19 }
  0xdd   :  { %1163 = vmatpush.bf16.msra.mxu2 %v1561_v24  ;;  %1176 = vmatpush.bf16.msra.mxu3 %v1689_v25 }
  0xde   :  { %1139 = vmatpush.bf16.msra.mxu0 %v1273_v30  ;;  %1152 = vmatpush.bf16.msra.mxu1 %v1401_v31  ;;  %v1189_v30 = vld [vmem:[#allocation8] sm:$0xf] }
  0xdf   :  { %v1193_v42 = vperm.slane %v1189_v30, 2  ;;  %v1194_v51 = vperm.slane %v1189_v30, 3 }
  0xe1   :  { %1164 = vmatpush.bf16.msra.mxu2 %v1545_v36  ;;  %1177 = vmatpush.bf16.msra.mxu3 %v1673_v37  ;;  %v1192_v36 = vperm.slane %v1189_v30, 1  ;;  %v1191_v37 = vperm.slane %v1189_v30, 0 }
  0xe2   :  { %1140 = vmatpush.bf16.msra.mxu0 %v1257_v44  ;;  %1153 = vmatpush.bf16.msra.mxu1 %v1385_v45 }
  0xe5   :  { %1165 = vmatpush.bf16.msra.mxu2 %v1529_v46  ;;  %1178 = vmatpush.bf16.msra.mxu3 %v1657_v47 }
  0xe6   :  { %1141 = vmatmul.bf16.vlgmr.msra.gmra.mxu0 %v2059_v39  ;;  %1154 = vmatmul.bf16.vlgmr.msra.gmra.mxu1 %v2061_v40 }
  0xe9   :  { %1166 = vmatpush.bf16.msra.mxu2 %v1513_v52  ;;  %1179 = vmatpush.bf16.msra.mxu3 %v1641_v53 }
  0xec   :  { %1167 = vmatmul.bf16.vlgmr.msra.gmra.mxu2 %v2065_v1  ;;  %1180 = vmatmul.bf16.vlgmr.msra.gmra.mxu3 %v2067_v2 }
 0x121   :  { %v986_v56 = vpop.f32.mrf.mxu0  ;;  %v999_v57 = vpop.f32.mrf.mxu1 }
 0x122   :  { %v987_v58 = vadd.f32 %v986_v56, %v329_v55 }
 0x124   :  { %v1000_v59 = vadd.f32 %v999_v57, %v987_v58 }
 0x129   :  { %v988_v60 = vpop.f32.mrf.mxu0  ;;  %v1001_v61 = vpop.f32.mrf.mxu1 }
 0x12f   :  { %v1012_v39 = vpop.f32.mrf.mxu2  ;;  %v1025_v62 = vpop.f32.mrf.mxu3 }
 0x130   :  { %v1013_v25 = vadd.f32 %v1012_v39, %v1000_v59  ;;  %v1892_v59 = vld [vmem:[#allocation2] ss:$0 sm:$0xff] }
 0x131   :  { %v1038_v40 = vpop.f32.mrf.mxu0  ;;  %v1051_v63 = vpop.f32.mrf.mxu1 }
 0x132   :  { %v1039_v18 = vadd.f32 %v1038_v40, %v330_v14  ;;  %v1026_v29 = vadd.f32 %v1025_v62, %v1013_v25 }
 0x134   :  { %v1052_v20 = vadd.f32 %v1051_v63, %v1039_v18  ;;  %v1185_v38 = vmax.f32 %v1026_v29, 0.0 }
 0x136   :  { %v1199_v48 = vmul.f32 %v1191_v37, %v1185_v38 }
 0x137   :  { %v1014_v0 = vpop.f32.mrf.mxu2  ;;  %v1027_v3 = vpop.f32.mrf.mxu3 }
 0x139   :  { %v1040_v1 = vpop.f32.mrf.mxu0  ;;  %v1053_v4 = vpop.f32.mrf.mxu1 }
 0x13f   :  { %v1064_v2 = vpop.f32.mrf.mxu2  ;;  %v1077_v5 = vpop.f32.mrf.mxu3 }
 0x140   :  { %v1065_v23 = vadd.f32 %v1064_v2, %v1052_v20 }
 0x142   :  { %v1078_v28 = vadd.f32 %v1077_v5, %v1065_v23 }
 0x144   :  { %v1090_v6 = vpop.f32.mrf.mxu0  ;;  %v1103_v7 = vpop.f32.mrf.mxu1  ;;  %v1186_v35 = vmax.f32 %v1078_v28, 0.0 }
 0x145   :  { %v1091_v19 = vadd.f32 %v1090_v6, %v331_v17 }
 0x146   :  { %v1200_v46 = vmul.f32 %v1192_v36, %v1186_v35 }
 0x147   :  { %v1066_v8 = vpop.f32.mrf.mxu2  ;;  %v1079_v9 = vpop.f32.mrf.mxu3  ;;  %v1104_v24 = vadd.f32 %v1103_v7, %v1091_v19 }
 0x148   :  { %v1203_v53 = vadd.f32 %v1200_v46, %v1199_v48 }
 0x14c   :  { %v1092_v10 = vpop.f32.mrf.mxu0  ;;  %v1105_v11 = vpop.f32.mrf.mxu1 }
 0x14f   :  { %v1116_v12 = vpop.f32.mrf.mxu2  ;;  %v1129_v13 = vpop.f32.mrf.mxu3 }
 0x150   :  { %v1117_v26 = vadd.f32 %v1116_v12, %v1104_v24 }
 0x152   :  { %v1130_v31 = vadd.f32 %v1129_v13, %v1117_v26 }
 0x154   :  { %v1187_v41 = vmax.f32 %v1130_v31, 0.0 }
 0x156   :  { %v1201_v49 = vmul.f32 %v1193_v42, %v1187_v41 }
 0x157   :  { %v1118_v15 = vpop.f32.mrf.mxu2  ;;  %v1131_v16 = vpop.f32.mrf.mxu3 }
 0x158   :  { %v1204_v55 = vadd.f32 %v1203_v53, %v1201_v49 }
 0x163   :  { %v1142_v21 = vpop.f32.mrf.mxu0  ;;  %v1155_v22 = vpop.f32.mrf.mxu1 }
 0x164   :  { %v1143_v32 = vadd.f32 %v1142_v21, %v332_v27 }
 0x166   :  { %v1156_v43 = vadd.f32 %v1155_v22, %v1143_v32 }
 0x16b   :  { %v1144_v33 = vpop.f32.mrf.mxu0  ;;  %v1157_v34 = vpop.f32.mrf.mxu1 }
 0x16f   :  { %v1168_v44 = vpop.f32.mrf.mxu2  ;;  %v1181_v45 = vpop.f32.mrf.mxu3 }
 0x170   :  { %v1169_v47 = vadd.f32 %v1168_v44, %v1156_v43 }
 0x172   :  { %v1182_v50 = vadd.f32 %v1181_v45, %v1169_v47 }
 0x174   :  { %v1188_v52 = vmax.f32 %v1182_v50, 0.0 }
 0x176   :  { %v1202_v54 = vmul.f32 %v1194_v51, %v1188_v52 }
 0x177   :  { %v1170_v56 = vpop.f32.mrf.mxu2  ;;  %v1183_v57 = vpop.f32.mrf.mxu3 }
 0x178   :  { %v1205_v58 = vadd.f32 %v1204_v55, %v1202_v54 }
 0x17a   :  { %1206 = vadd.xlane.f32.xlu0 %v1205_v58 }
 0x1ed   :  { %v1207_v60 = vpop.xlane.xlu0 %1206 }
 0x1ee   :  { %v1212_v61 = vadd.f32 %v1892_v59, %v1207_v60 }
 0x1f0   :  { %1214 = vst.msk [vmem:[%s2095_s6] sm:$0xff] %vm1213_vm2, %v1212_v61 }
 0x1f1   :  { %1219 = vsyncpa [#allocation4], 1 }
 0x1f2   :  { %1220 = vsyncpa [#allocation6], 1 }
 0x1f3   :  { %1221 = vsyncpa [#allocation9], 1 }

</bundles_post_ra>
